<compile_context>
chip_gen: v5e
topology: v5e:2x2
jax: 0.10.0
libtpu: 0.0.40
codegen_flags: <defaults>
</compile_context>

<pallas_src>
import jax
import jax.numpy as jnp
from jax.experimental import pallas as pl
from jax.experimental.pallas import tpu as pltpu

# Logical (PyTorch) sizes
IN_F, HID_F, OUT_F = 2, 10, 1
# Hidden dim padded to one full lane width so all VPU/XLU work is lane-dense.
HID_PAD = 128
# w1p rows: row 0 = W1[0,:], row 1 = W1[1,:], row 2 = b1 (augmented bias).
W1P_ROWS = IN_F + 1


def mlp_kernel(x_ref, w1_ref, w2_ref, b2_ref, o_ref):
    x = x_ref[...]                                            # (B, IN_F) f32
    # Linear(2,10): two VPU broadcast-FMAs + bias row; MXU skipped entirely.
    z = (x[:, 0:1] * w1_ref[0:1, :]
         + x[:, 1:2] * w1_ref[1:2, :]
         + w1_ref[2:3, :])                                    # (B, HID_PAD)
    # Sigmoid on the EUP (transcendental slot).  Padded lanes give 0.5 but are
    # zeroed out by w2 below.
    h = jax.nn.sigmoid(z)
    # Linear(10,1): OUT_F == 1, so per-lane multiply + cross-lane reduce
    # (VPU + XLU) against a (1, HID_PAD) weight row instead of the MXU.
    y = jnp.sum(h * w2_ref[...], axis=-1, keepdims=True)      # (B, 1)
    # b2 is a scalar living in SMEM.
    o_ref[...] = (y + b2_ref[0, 0]).astype(o_ref.dtype)


def pad_params(w1, b1, w2, b2):
    """Build TPU-padded parameters ONCE (hoisted out of the per-call path)."""
    # W1 rows + b1 folded in as the last row (augmented-bias trick).
    w1p = jnp.zeros((W1P_ROWS, HID_PAD), jnp.float32)
    w1p = w1p.at[:IN_F, :HID_F].set(w1)
    w1p = w1p.at[IN_F, :HID_F].set(b1)
    # W2 stored as a (1, HID_PAD) row so the kernel can do a VPU dot-reduce.
    w2p = jnp.zeros((1, HID_PAD), jnp.float32).at[0, :HID_F].set(w2[:, 0])
    # b2 as a (1, 1) SMEM scalar.
    b2p = jnp.asarray(b2, jnp.float32).reshape(1, 1)
    return w1p, w2p, b2p


@jax.jit
def mynet_forward(x, w1p, w2p, b2p):
    """x: (B, 2) float32 -> (B, 1) float32, matching PyTorch mynet.forward."""
    B = x.shape[0]
    vmem = pl.BlockSpec(memory_space=pltpu.MemorySpace.VMEM)
    smem = pl.BlockSpec(memory_space=pltpu.MemorySpace.SMEM)
    # No wrapper-side pad/slice: x and the output use their natural shapes as
    # whole-array blocks (Mosaic pads the layout internally).
    return pl.pallas_call(
        mlp_kernel,
        out_shape=jax.ShapeDtypeStruct((B, OUT_F), jnp.float32),
        in_specs=[vmem, vmem, vmem, smem],
        out_specs=vmem,
    )(x, w1p, w2p, b2p)


def init_params(key):
    """Deterministic init mimicking PyTorch nn.Linear (uniform +-1/sqrt(fan_in))."""
    k1, k2, k3, k4 = jax.random.split(key, 4)
    bound1 = 1.0 / jnp.sqrt(float(IN_F))
    bound2 = 1.0 / jnp.sqrt(float(HID_F))
    w1 = jax.random.uniform(k1, (IN_F, HID_F), jnp.float32, -bound1, bound1)
    b1 = jax.random.uniform(k2, (HID_F,), jnp.float32, -bound1, bound1)
    w2 = jax.random.uniform(k3, (HID_F, OUT_F), jnp.float32, -bound2, bound2)
    b2 = jax.random.uniform(k4, (OUT_F,), jnp.float32, -bound2, bound2)
    return w1, b1, w2, b2


if __name__ == "__main__":
    key = jax.random.PRNGKey(0)
    w1, b1, w2, b2 = init_params(key)
    # Padded weights are built once and reused for every forward call.
    w1p, w2p, b2p = pad_params(w1, b1, w2, b2)

    # Same inputs as the PyTorch script: XOR truth table, shape (4, 2) float32.
    x = jnp.array([[0, 0], [0, 1], [1, 0], [1, 1]], dtype=jnp.float32)

    out = mynet_forward(x, w1p, w2p, b2p)
    out = jax.block_until_ready(out)

    # Pure-JAX reference check of the same math.
    ref = jnp.dot(1.0 / (1.0 + jnp.exp(-(x @ w1 + b1))), w2) + b2
    assert out.shape == (4, 1)
    assert jnp.allclose(out, ref, atol=1e-4, rtol=1e-4)

    print("KERNEL_OK")
</pallas_src>

<mosaic_0001>
module attributes {stable_mosaic.version = 11 : i64} {
  func.func @mlp_kernel(%arg0: memref<4x2xf32, #tpu.memory_space<vmem>>, %arg1: memref<3x128xf32, #tpu.memory_space<vmem>>, %arg2: memref<1x128xf32, #tpu.memory_space<vmem>>, %arg3: memref<1x1xf32, #tpu.memory_space<smem>>, %arg4: memref<4x1xf32, #tpu.memory_space<vmem>>) attributes {dimension_semantics = [], scalar_prefetch = 0 : i64, scratch_operands = 0 : i64, tpu.core_type = #tpu.core_type<tc>} {
    %c0 = arith.constant 0 : index
    %c0_0 = arith.constant 0 : index
    %0 = vector.load %arg0[%c0, %c0_0] : memref<4x2xf32, #tpu.memory_space<vmem>>, vector<4x2xf32>
    %1 = vector.extract_strided_slice %0 {offsets = [0, 0], sizes = [4, 1], strides = [1, 1]} : vector<4x2xf32> to vector<4x1xf32>
    %c0_1 = arith.constant 0 : index
    %c0_2 = arith.constant 0 : index
    %2 = vector.load %arg1[%c0_1, %c0_2] : memref<3x128xf32, #tpu.memory_space<vmem>>, vector<1x128xf32>
    %3 = vector.broadcast %1 : vector<4x1xf32> to vector<4x128xf32>
    %4 = vector.broadcast %2 : vector<1x128xf32> to vector<4x128xf32>
    %5 = arith.mulf %3, %4 : vector<4x128xf32>
    %6 = vector.extract_strided_slice %0 {offsets = [0, 1], sizes = [4, 1], strides = [1, 1]} : vector<4x2xf32> to vector<4x1xf32>
    %c1 = arith.constant 1 : index
    %c0_3 = arith.constant 0 : index
    %7 = vector.load %arg1[%c1, %c0_3] : memref<3x128xf32, #tpu.memory_space<vmem>>, vector<1x128xf32>
    %8 = vector.broadcast %6 : vector<4x1xf32> to vector<4x128xf32>
    %9 = vector.broadcast %7 : vector<1x128xf32> to vector<4x128xf32>
    %10 = arith.mulf %8, %9 : vector<4x128xf32>
    %11 = arith.addf %5, %10 : vector<4x128xf32>
    %c2 = arith.constant 2 : index
    %c0_4 = arith.constant 0 : index
    %12 = vector.load %arg1[%c2, %c0_4] : memref<3x128xf32, #tpu.memory_space<vmem>>, vector<1x128xf32>
    %13 = vector.broadcast %12 : vector<1x128xf32> to vector<4x128xf32>
    %14 = arith.addf %11, %13 : vector<4x128xf32>
    %15 = arith.negf %14 : vector<4x128xf32>
    %16 = math.exp %15 : vector<4x128xf32>
    %cst = arith.constant 1.000000e+00 : f32
    %17 = vector.broadcast %cst : f32 to vector<4x128xf32>
    %18 = arith.addf %17, %16 : vector<4x128xf32>
    %19 = arith.divf %17, %18 : vector<4x128xf32>
    %c0_5 = arith.constant 0 : index
    %c0_6 = arith.constant 0 : index
    %20 = vector.load %arg2[%c0_5, %c0_6] : memref<1x128xf32, #tpu.memory_space<vmem>>, vector<1x128xf32>
    %21 = vector.broadcast %20 : vector<1x128xf32> to vector<4x128xf32>
    %22 = arith.mulf %19, %21 : vector<4x128xf32>
    %cst_7 = arith.constant dense<0.000000e+00> : vector<4xf32>
    %23 = vector.multi_reduction <add>, %22, %cst_7 [1] : vector<4x128xf32> to vector<4xf32>
    %24 = vector.shape_cast %23 : vector<4xf32> to vector<4x1xf32>
    %c0_8 = arith.constant 0 : index
    %c0_9 = arith.constant 0 : index
    %25 = memref.load %arg3[%c0_8, %c0_9] : memref<1x1xf32, #tpu.memory_space<smem>>
    %26 = vector.broadcast %25 : f32 to vector<4x1xf32>
    %27 = arith.addf %24, %26 : vector<4x1xf32>
    %c0_10 = arith.constant 0 : index
    %c0_11 = arith.constant 0 : index
    %28 = vector.load %arg4[%c0_10, %c0_11] : memref<4x1xf32, #tpu.memory_space<vmem>>, vector<4x1xf32>
    tpu.vector_store %arg4[%c0_10, %c0_11], %27 {strides = array<i32>} : memref<4x1xf32, #tpu.memory_space<vmem>>, vector<4x1xf32>,
    return
  }
}

</mosaic_0001>

<bundles_post_ra>
// kernel: mynet_forward.1
= control target key start
LH: loop header
LB: loop body
LE: loop exit
PB: predicated region body
PF: predicated region fallthrough
CT: control target
= control target key end

     0   :  { %v88_v0 = vmov 0   ;;  %v89_v2 = vmov 1   ;;  %vm62_vm4 = vcmask 1043456   ;;  %vm69_vm5 = vcmask 3072   ;;  %s136_s0 = inlined_call_operand.vmem [shape: f32[4,2], index: 0, kind: input, shape index: {}]   ;;  %s137_s1 = inlined_call_operand.vmem [shape: f32[3,128], index: 1, kind: input, shape index: {}]   ;;  %s138_s2 = inlined_call_operand.vmem [shape: f32[1,128], index: 2, kind: input, shape index: {}]   ;;  %s139_s3 = inlined_call_operand.<no memory space> [shape: f32[1,1], index: 3, kind: input, shape index: {}]   ;;  %s140_s4 = inlined_call_operand.vmem [shape: f32[4,1], index: 4, kind: output, shape index: {}]  }
   0x1   :  { %78 = vset.pattern.permute.xlu0 %v88_v0  ;;  %v18_v1 = vld [vmem:[%s136_s0] sm:$0xf]  ;;  %v67_v28 = vstv %s139_s3 }
   0x2   :  { %22 = vperm.xlu0 %78, %v18_v1   ;;  %v80_v4 = vld [vmem:[%s137_s1] ss:$0 sm:$0xff]  ;;  %v81_v5 = vld [vmem:[%s137_s1 + $0x1] ss:$0 sm:$0xff]  ;;  %v82_v8 = vld [vmem:[%s137_s1 + $0x2] ss:$0 sm:$0xff] }
   0x3   :  { %v83_v22 = vld [vmem:[%s138_s2] ss:$0 sm:$0xff] }
   0xa   :  { %79 = vset.pattern.permute.xlu0 %v89_v2 }
   0xb   :  { %29 = vperm.xlu0 %79, %v18_v1  }
  0x74   :  { %v23_v3 = vpop.permute.xlu0 %22 }
  0x75   :  { %v26_v7 = vmul.f32 %v80_v4, %v23_v3 }
  0x7d   :  { %v30_v6 = vpop.permute.xlu0 %29 }
  0x7e   :  { %v33_v9 = vmul.f32 %v81_v5, %v30_v6 }
  0x80   :  { %v34_v10 = vadd.f32 %v33_v9, %v26_v7 }
  0x82   :  { %v37_v11 = vadd.f32 %v82_v8, %v34_v10 }
  0x84   :  { %v75_v12 = vmul.f32 -1.442695, %v37_v11 }
  0x86   :  { %84 = vpow2.f32 %v75_v12 }
  0x8c   :  { %v85_v13 = vpop.eup %84 }
  0x8d   :  { %v41_v14 = vadd.f32 1.0, %v85_v13 }
  0x8f   :  { %86 = vrcp.f32 %v41_v14  ;;  %v53_v18 = vand.u32 2147483648, %v41_v14  ;;  %v51_v20 = vand.u32 2147483647, %v41_v14  ;;  %vm47_vm1 = vweird.f32 %v41_v14 }
  0x91   :  { %v54_v23 = vor.u32 1.1754944e-38, %v53_v18  ;;  %vm52_vm3 = vcmp.eq.f32.partialorder %v51_v20, 8.507059e+37 }
  0x95   :  { %v87_v15 = vpop.eup %86 }
  0x96   :  { %v43_v16 = vmul.f32 %v87_v15, %v41_v14  ;;  %vm48_vm0 = vweird.f32 %v87_v15 }
  0x97   :  { %vm49_vm2 = vmor %vm47_vm1, %vm48_vm0 }
  0x98   :  { %v44_v17 = vsub.f32 1.0, %v43_v16 }
  0x9a   :  { %v45_v19 = vmul.f32 %v87_v15, %v44_v17 }
  0x9c   :  { %v46_v21 = vadd.f32 %v87_v15, %v45_v19 }
  0x9e   :  { %v50_v24 = vsel %vm49_vm2, %v87_v15, %v46_v21 }
  0x9f   :  { %v55_v25 = vsel %vm52_vm3, %v54_v23, %v50_v24 }
  0xa0   :  { %v61_v26 = vmul.f32 %v83_v22, %v55_v25 }
  0xa2   :  { %v63_v27 = vsel %vm62_vm4, %v61_v26, 0.0 }
  0xa3   :  { %64 = vadd.xlane.f32.xlu1 %v63_v27 }
 0x116   :  { %v65_v29 = vpop.xlane.xlu1 %64 }
 0x117   :  { %v68_v30 = vadd.f32 %v67_v28, %v65_v29 }
 0x119   :  { %70 = vst.msk [vmem:[%s140_s4] sm:$0xf] %vm69_vm5, %v68_v30 }

</bundles_post_ra>
